<compile_context>
chip_gen: v7x
topology: tpu7x:2x2x1
jax: 0.10.0
libtpu: 0.0.40
codegen_flags: <defaults>
</compile_context>

<pallas_src>
import functools

import jax
import jax.numpy as jnp
from jax import lax
from jax.experimental import pallas as pl
from jax.experimental.pallas import tpu as pltpu


# Murmur3-finalizer style mixing constants, written as signed int32 literals.
_GOLD = -1640531527   # 0x9E3779B9
_MIX1 = -2048144789   # 0x85EBCA6B
_MIX2 = -1028477387   # 0xC2B2AE35


def _uniform_from_counter(idx, seed):
    """Counter-based uniform(0,1) noise from an int32 element index + seed.

    Pure int32 VPU ops (mul/xor/shift/and) -> portable to Mosaic and the TPU
    interpreter.  Uses the low 23 bits so the int->float convert is exact.
    """
    h = idx + seed * jnp.int32(_GOLD)
    h = h ^ (h >> 16)
    h = h * jnp.int32(_MIX1)
    h = h ^ (h >> 13)
    h = h * jnp.int32(_MIX2)
    h = h ^ (h >> 16)
    bits = h & jnp.int32(0x7FFFFF)                       # in [0, 2^23)
    return bits.astype(jnp.float32) * jnp.float32(1.0 / (1 << 23))


def _generator_kernel(seed_ref, x_ref, wconv_ref, bconv_ref, wlin_ref,
                      blin_ref, out_ref, *, inv_temperature):
    # seed_ref:  (1,) int32 in SMEM (scalar prefetch)
    # x_ref:     (Bt, L, F) f32      one batch tile
    # wconv_ref: (3F, H)    bf16     conv taps stacked along K (offsets -1,0,+1)
    # bconv_ref: (1, H)     f32
    # wlin_ref:  (H, D)     bf16
    # blin_ref:  (1, D)     f32
    # out_ref:   (Bt, L, D) f32
    bt, L, F = x_ref.shape
    D = out_ref.shape[-1]
    R = bt * L                                           # MXU rows this step

    # ---- Conv1d(F->H, k=3, pad=1) as ONE (R, 3F) x (3F, H) matmul ----------
    x3 = x_ref[...].astype(jnp.bfloat16)                 # (Bt, L, F)
    zrow = jnp.zeros((bt, 1, F), jnp.bfloat16)
    x_prev = jnp.concatenate([zrow, x3[:, :L - 1, :]], axis=1)   # x[l-1], 0-pad
    x_next = jnp.concatenate([x3[:, 1:, :], zrow], axis=1)       # x[l+1], 0-pad
    x_cat = jnp.concatenate([x_prev, x3, x_next], axis=-1)       # (Bt, L, 3F)
    x_cat = x_cat.reshape(R, 3 * F)

    h = jnp.dot(x_cat, wconv_ref[...], preferred_element_type=jnp.float32)
    h = jnp.maximum(h + bconv_ref[...], 0.0)             # (R, H) f32, ReLU

    # ---- Linear(H -> D) -----------------------------------------------------
    logits = jnp.dot(h.astype(jnp.bfloat16), wlin_ref[...],
                     preferred_element_type=jnp.float32) + blin_ref[...]

    # ---- softmax_gumbel_noise(logits, temperature) --------------------------
    row = lax.broadcasted_iota(jnp.int32, (R, 1), 0)
    col = lax.broadcasted_iota(jnp.int32, (1, D), 1)
    idx = (pl.program_id(0) * R + row) * D + col         # unique per element
    u = _uniform_from_counter(idx, seed_ref[0])          # (R, D) in [0, 1)

    eps = 1e-20
    gumbel = -jnp.log(-jnp.log(u + eps) + eps)
    y = (logits + gumbel) * inv_temperature
    y = y - jnp.max(y, axis=-1, keepdims=True)
    e = jnp.exp(y)
    soft = e * (1.0 / jnp.sum(e, axis=-1, keepdims=True))

    out_ref[...] = soft.reshape(bt, L, D).astype(out_ref.dtype)


def _pick_block_batch(batch, seq_len, target_rows=256):
    """Largest batch tile that divides B, keeps >= 2 grid steps when possible
    (v7x dual-TensorCore), and reaches ~target_rows MXU rows per step."""
    divisors = [d for d in range(1, batch + 1) if batch % d == 0]
    cands = [d for d in divisors if batch // d >= 2] or divisors
    for d in cands:                                      # ascending
        if d * seq_len >= target_rows:
            return d
    return cands[-1]


def conv_generator_net(x, w_conv, b_conv, w_lin, b_lin, *, seed=0,
                       temperature=0.9, block_batch=None):
    """x: (B, L, F) f32; w_conv: (3, F, H); b_conv: (H,); w_lin: (H, D);
    b_lin: (D,)  ->  soft_prob: (B, L, D) f32."""
    B, L, F = x.shape
    assert w_conv.shape[0] == 3 and w_conv.shape[1] == F
    H = w_conv.shape[2]
    D = w_lin.shape[1]

    bt = _pick_block_batch(B, L) if block_batch is None else block_batch
    assert B % bt == 0, "block_batch must divide the batch size"
    grid = (B // bt,)

    # Stack the 3 conv taps along K once in the wrapper; keep MXU operands bf16.
    w_conv_cat = jnp.asarray(w_conv, jnp.float32).reshape(3 * F, H).astype(jnp.bfloat16)
    w_lin_b = jnp.asarray(w_lin, jnp.float32).astype(jnp.bfloat16)
    b_conv2 = jnp.asarray(b_conv, jnp.float32).reshape(1, H)
    b_lin2 = jnp.asarray(b_lin, jnp.float32).reshape(1, D)
    seed_arr = jnp.asarray([seed], dtype=jnp.int32)

    kernel = functools.partial(_generator_kernel,
                               inv_temperature=1.0 / float(temperature))

    cost = pl.CostEstimate(
        flops=2 * B * L * (3 * F * H + H * D),
        transcendentals=3 * B * L * D,                   # 2x log + 1x exp / elem
        bytes_accessed=(x.size * x.dtype.itemsize        # x in
                        + B * L * D * 4                  # out
                        + (3 * F * H + H * D) * 2        # bf16 weights
                        + (H + D) * 4),                  # f32 biases
    )

    return pl.pallas_call(
        kernel,
        out_shape=jax.ShapeDtypeStruct((B, L, D), jnp.float32),
        grid_spec=pltpu.PrefetchScalarGridSpec(
            num_scalar_prefetch=1,                       # seed -> SMEM
            grid=grid,
            in_specs=[
                pl.BlockSpec((bt, L, F), lambda b, s: (b, 0, 0)),   # x tile
                pl.BlockSpec((3 * F, H), lambda b, s: (0, 0)),      # conv W
                pl.BlockSpec((1, H),     lambda b, s: (0, 0)),      # conv b
                pl.BlockSpec((H, D),     lambda b, s: (0, 0)),      # linear W
                pl.BlockSpec((1, D),     lambda b, s: (0, 0)),      # linear b
            ],
            out_specs=pl.BlockSpec((bt, L, D), lambda b, s: (b, 0, 0)),
        ),
        compiler_params=pltpu.CompilerParams(
            dimension_semantics=("parallel",)),
        cost_estimate=cost,
    )(seed_arr, x, w_conv_cat, b_conv2, w_lin_b, b_lin2)


if __name__ == "__main__":
    # Small shapes consistent with the module:
    #   concat_window=1, encoder_element_size=32 -> F = 32
    #   gen_hidden_size H = 32, dictionary_size D = 64
    B, L, F, H, D = 2, 16, 32, 32, 64
    temperature = 0.9

    key = jax.random.PRNGKey(0)
    k_x, k_wc, k_bc, k_wl, k_bl = jax.random.split(key, 5)

    x = jax.random.normal(k_x, (B, L, F), dtype=jnp.float32)

    # Synthetic parameters with the same shapes as Conv1d(F, H, 3) / Linear(H, D),
    # stored tap-major (3, F, H) which is the kernel's matmul layout.
    w_conv = jax.random.normal(k_wc, (3, F, H), dtype=jnp.float32) * 0.1
    b_conv = jax.random.normal(k_bc, (H,), dtype=jnp.float32) * 0.1
    w_lin = jax.random.normal(k_wl, (H, D), dtype=jnp.float32) * 0.1
    b_lin = jax.random.normal(k_bl, (D,), dtype=jnp.float32) * 0.1

    soft_prob = conv_generator_net(x, w_conv, b_conv, w_lin, b_lin,
                                   seed=1234, temperature=temperature)
    soft_prob = jax.block_until_ready(soft_prob)

    assert soft_prob.shape == (B, L, D)
    assert bool(jnp.all(jnp.isfinite(soft_prob)))
    assert bool(jnp.all(soft_prob >= 0.0))
    # Rows of soft_prob are a softmax -> sum to ~1.
    assert bool(jnp.allclose(jnp.sum(soft_prob, axis=-1), 1.0, atol=1e-3))
    print("KERNEL_OK")
</pallas_src>

<mosaic_0001>
module attributes {stable_mosaic.version = 11 : i64} {
  func.func @_generator_kernel(%arg0: i32, %arg1: memref<1xi32, #tpu.memory_space<smem>>, %arg2: memref<1x16x32xf32, #tpu.memory_space<vmem>>, %arg3: memref<96x32xbf16, #tpu.memory_space<vmem>>, %arg4: memref<1x32xf32, #tpu.memory_space<vmem>>, %arg5: memref<32x64xbf16, #tpu.memory_space<vmem>>, %arg6: memref<1x64xf32, #tpu.memory_space<vmem>>, %arg7: memref<1x16x64xf32, #tpu.memory_space<vmem>>) attributes {dimension_semantics = [#tpu.dimension_semantics<parallel>], iteration_bounds = array<i64: 2>, scalar_prefetch = 1 : i64, scratch_operands = 0 : i64, tpu.core_type = #tpu.core_type<tc>, window_params = [{transform_indices = @transform_0, window_bounds = array<i64: 1, 16, 32>}, {pipeline_mode = #tpu.pipeline_mode<synchronous>, transform_indices = @transform_1, window_bounds = array<i64: 96, 32>}, {pipeline_mode = #tpu.pipeline_mode<synchronous>, transform_indices = @transform_2, window_bounds = array<i64: 1, 32>}, {pipeline_mode = #tpu.pipeline_mode<synchronous>, transform_indices = @transform_3, window_bounds = array<i64: 32, 64>}, {pipeline_mode = #tpu.pipeline_mode<synchronous>, transform_indices = @transform_4, window_bounds = array<i64: 1, 64>}, {transform_indices = @transform_5, window_bounds = array<i64: 1, 16, 64>}]} {
    %c0 = arith.constant 0 : index
    %c0_0 = arith.constant 0 : index
    %c0_1 = arith.constant 0 : index
    %0 = vector.load %arg2[%c0, %c0_0, %c0_1] : memref<1x16x32xf32, #tpu.memory_space<vmem>>, vector<1x16x32xf32>
    %1 = arith.truncf %0 : vector<1x16x32xf32> to vector<1x16x32xbf16>
    %cst = arith.constant 0.000000e+00 : bf16
    %2 = vector.broadcast %cst : bf16 to vector<1x1x32xbf16>
    %3 = vector.extract_strided_slice %1 {offsets = [0, 0, 0], sizes = [1, 15, 32], strides = [1, 1, 1]} : vector<1x16x32xbf16> to vector<1x15x32xbf16>
    %4 = tpu.concatenate %2, %3 in 1 : vector<1x1x32xbf16>, vector<1x15x32xbf16> -> vector<1x16x32xbf16>
    %5 = vector.extract_strided_slice %1 {offsets = [0, 1, 0], sizes = [1, 15, 32], strides = [1, 1, 1]} : vector<1x16x32xbf16> to vector<1x15x32xbf16>
    %6 = tpu.concatenate %5, %2 in 1 : vector<1x15x32xbf16>, vector<1x1x32xbf16> -> vector<1x16x32xbf16>
    %7 = tpu.concatenate %4, %1, %6 in 2 : vector<1x16x32xbf16>, vector<1x16x32xbf16>, vector<1x16x32xbf16> -> vector<1x16x96xbf16>
    %8 = vector.shape_cast %7 : vector<1x16x96xbf16> to vector<16x96xbf16>
    %c0_2 = arith.constant 0 : index
    %c0_3 = arith.constant 0 : index
    %9 = vector.load %arg3[%c0_2, %c0_3] : memref<96x32xbf16, #tpu.memory_space<vmem>>, vector<96x32xbf16>
    %cst_4 = arith.constant dense<0.000000e+00> : vector<16x32xf32>
    %10 = tpu.matmul %8, %9, %cst_4 {dimension_numbers = #tpu.dot_dimension_numbers<[1], [0], [0], [1], [0, 0, 1, 1], [], []>} : vector<16x96xbf16>, vector<96x32xbf16>, vector<16x32xf32> -> vector<16x32xf32>
    %c0_5 = arith.constant 0 : index
    %c0_6 = arith.constant 0 : index
    %11 = vector.load %arg4[%c0_5, %c0_6] : memref<1x32xf32, #tpu.memory_space<vmem>>, vector<1x32xf32>
    %12 = vector.broadcast %11 : vector<1x32xf32> to vector<16x32xf32>
    %13 = arith.addf %10, %12 : vector<16x32xf32>
    %cst_7 = arith.constant 0.000000e+00 : f32
    %14 = vector.broadcast %cst_7 : f32 to vector<16x32xf32>
    %15 = arith.maximumf %13, %14 : vector<16x32xf32>
    %16 = arith.truncf %15 : vector<16x32xf32> to vector<16x32xbf16>
    %c0_8 = arith.constant 0 : index
    %c0_9 = arith.constant 0 : index
    %17 = vector.load %arg5[%c0_8, %c0_9] : memref<32x64xbf16, #tpu.memory_space<vmem>>, vector<32x64xbf16>
    %cst_10 = arith.constant dense<0.000000e+00> : vector<16x64xf32>
    %18 = tpu.matmul %16, %17, %cst_10 {dimension_numbers = #tpu.dot_dimension_numbers<[1], [0], [0], [1], [0, 0, 1, 1], [], []>} : vector<16x32xbf16>, vector<32x64xbf16>, vector<16x64xf32> -> vector<16x64xf32>
    %c0_11 = arith.constant 0 : index
    %c0_12 = arith.constant 0 : index
    %19 = vector.load %arg6[%c0_11, %c0_12] : memref<1x64xf32, #tpu.memory_space<vmem>>, vector<1x64xf32>
    %20 = vector.broadcast %19 : vector<1x64xf32> to vector<16x64xf32>
    %21 = arith.addf %18, %20 : vector<16x64xf32>
    %22 = tpu.iota {dimensions = array<i32: 0>} : vector<16x1xi32>
    %23 = tpu.iota {dimensions = array<i32: 1>} : vector<1x64xi32>
    %c16_i32 = arith.constant 16 : i32
    %24 = arith.muli %arg0, %c16_i32 : i32
    %25 = vector.broadcast %24 : i32 to vector<16x1xi32>
    %26 = arith.addi %25, %22 : vector<16x1xi32>
    %c64_i32 = arith.constant 64 : i32
    %27 = vector.broadcast %c64_i32 : i32 to vector<16x1xi32>
    %28 = arith.muli %26, %27 : vector<16x1xi32>
    %29 = vector.broadcast %28 : vector<16x1xi32> to vector<16x64xi32>
    %30 = vector.broadcast %23 : vector<1x64xi32> to vector<16x64xi32>
    %31 = arith.addi %29, %30 : vector<16x64xi32>
    %c0_13 = arith.constant 0 : index
    %32 = memref.load %arg1[%c0_13] : memref<1xi32, #tpu.memory_space<smem>>
    %c-1640531527_i32 = arith.constant -1640531527 : i32
    %33 = arith.muli %32, %c-1640531527_i32 : i32
    %34 = vector.broadcast %33 : i32 to vector<16x64xi32>
    %35 = arith.addi %31, %34 : vector<16x64xi32>
    %c16_i32_14 = arith.constant 16 : i32
    %36 = vector.broadcast %c16_i32_14 : i32 to vector<16x64xi32>
    %37 = arith.shrsi %35, %36 : vector<16x64xi32>
    %38 = arith.xori %35, %37 : vector<16x64xi32>
    %c-2048144789_i32 = arith.constant -2048144789 : i32
    %39 = vector.broadcast %c-2048144789_i32 : i32 to vector<16x64xi32>
    %40 = arith.muli %38, %39 : vector<16x64xi32>
    %c13_i32 = arith.constant 13 : i32
    %41 = vector.broadcast %c13_i32 : i32 to vector<16x64xi32>
    %42 = arith.shrsi %40, %41 : vector<16x64xi32>
    %43 = arith.xori %40, %42 : vector<16x64xi32>
    %c-1028477387_i32 = arith.constant -1028477387 : i32
    %44 = vector.broadcast %c-1028477387_i32 : i32 to vector<16x64xi32>
    %45 = arith.muli %43, %44 : vector<16x64xi32>
    %c16_i32_15 = arith.constant 16 : i32
    %46 = vector.broadcast %c16_i32_15 : i32 to vector<16x64xi32>
    %47 = arith.shrsi %45, %46 : vector<16x64xi32>
    %48 = arith.xori %45, %47 : vector<16x64xi32>
    %c8388607_i32 = arith.constant 8388607 : i32
    %49 = vector.broadcast %c8388607_i32 : i32 to vector<16x64xi32>
    %50 = arith.andi %48, %49 : vector<16x64xi32>
    %51 = arith.sitofp %50 : vector<16x64xi32> to vector<16x64xf32>
    %cst_16 = arith.constant 1.1920929E-7 : f32
    %52 = vector.broadcast %cst_16 : f32 to vector<16x64xf32>
    %53 = arith.mulf %51, %52 : vector<16x64xf32>
    %cst_17 = arith.constant 9.99999968E-21 : f32
    %54 = vector.broadcast %cst_17 : f32 to vector<16x64xf32>
    %55 = arith.addf %53, %54 : vector<16x64xf32>
    %56 = math.log %55 : vector<16x64xf32>
    %cst_18 = arith.constant 0.000000e+00 : f32
    %57 = vector.broadcast %cst_18 : f32 to vector<16x64xf32>
    %58 = arith.subf %57, %56 : vector<16x64xf32>
    %cst_19 = arith.constant 9.99999968E-21 : f32
    %59 = vector.broadcast %cst_19 : f32 to vector<16x64xf32>
    %60 = arith.addf %58, %59 : vector<16x64xf32>
    %61 = math.log %60 : vector<16x64xf32>
    %cst_20 = arith.constant 0.000000e+00 : f32
    %62 = vector.broadcast %cst_20 : f32 to vector<16x64xf32>
    %63 = arith.subf %62, %61 : vector<16x64xf32>
    %64 = arith.addf %21, %63 : vector<16x64xf32>
    %cst_21 = arith.constant 1.11111116 : f32
    %65 = vector.broadcast %cst_21 : f32 to vector<16x64xf32>
    %66 = arith.mulf %64, %65 : vector<16x64xf32>
    %cst_22 = arith.constant dense<0xFF800000> : vector<16xf32>
    %67 = vector.multi_reduction <maximumf>, %66, %cst_22 [1] : vector<16x64xf32> to vector<16xf32>
    %68 = vector.shape_cast %67 : vector<16xf32> to vector<16x1xf32>
    %69 = vector.broadcast %68 : vector<16x1xf32> to vector<16x64xf32>
    %70 = arith.subf %66, %69 : vector<16x64xf32>
    %71 = math.exp %70 : vector<16x64xf32>
    %cst_23 = arith.constant dense<0.000000e+00> : vector<16xf32>
    %72 = vector.multi_reduction <add>, %71, %cst_23 [1] : vector<16x64xf32> to vector<16xf32>
    %73 = vector.shape_cast %72 : vector<16xf32> to vector<16x1xf32>
    %cst_24 = arith.constant 1.000000e+00 : f32
    %74 = vector.broadcast %cst_24 : f32 to vector<16x1xf32>
    %75 = arith.divf %74, %73 : vector<16x1xf32>
    %76 = vector.broadcast %75 : vector<16x1xf32> to vector<16x64xf32>
    %77 = arith.mulf %71, %76 : vector<16x64xf32>
    %78 = vector.shape_cast %77 : vector<16x64xf32> to vector<1x16x64xf32>
    %c0_25 = arith.constant 0 : index
    %c0_26 = arith.constant 0 : index
    %c0_27 = arith.constant 0 : index
    %79 = vector.load %arg7[%c0_25, %c0_26, %c0_27] : memref<1x16x64xf32, #tpu.memory_space<vmem>>, vector<1x16x64xf32>
    tpu.vector_store %arg7[%c0_25, %c0_26, %c0_27], %78 {strides = array<i32>} : memref<1x16x64xf32, #tpu.memory_space<vmem>>, vector<1x16x64xf32>,
    return
  }
  func.func @transform_0(%arg0: i32, %arg1: memref<1xi32, #tpu.memory_space<smem>>) -> (i32, i32, i32) {
    %c0_i32 = arith.constant 0 : i32
    %c0_i32_0 = arith.constant 0 : i32
    %c0_i32_1 = arith.constant 0 : i32
    return %arg0, %c0_i32, %c0_i32_0 : i32, i32, i32
  }
  func.func @transform_1(%arg0: i32, %arg1: memref<1xi32, #tpu.memory_space<smem>>) -> (i32, i32) {
    %c0_i32 = arith.constant 0 : i32
    %c0_i32_0 = arith.constant 0 : i32
    %c0_i32_1 = arith.constant 0 : i32
    return %c0_i32, %c0_i32_0 : i32, i32
  }
  func.func @transform_2(%arg0: i32, %arg1: memref<1xi32, #tpu.memory_space<smem>>) -> (i32, i32) {
    %c0_i32 = arith.constant 0 : i32
    %c0_i32_0 = arith.constant 0 : i32
    %c0_i32_1 = arith.constant 0 : i32
    return %c0_i32, %c0_i32_0 : i32, i32
  }
  func.func @transform_3(%arg0: i32, %arg1: memref<1xi32, #tpu.memory_space<smem>>) -> (i32, i32) {
    %c0_i32 = arith.constant 0 : i32
    %c0_i32_0 = arith.constant 0 : i32
    %c0_i32_1 = arith.constant 0 : i32
    return %c0_i32, %c0_i32_0 : i32, i32
  }
  func.func @transform_4(%arg0: i32, %arg1: memref<1xi32, #tpu.memory_space<smem>>) -> (i32, i32) {
    %c0_i32 = arith.constant 0 : i32
    %c0_i32_0 = arith.constant 0 : i32
    %c0_i32_1 = arith.constant 0 : i32
    return %c0_i32, %c0_i32_0 : i32, i32
  }
  func.func @transform_5(%arg0: i32, %arg1: memref<1xi32, #tpu.memory_space<smem>>) -> (i32, i32, i32) {
    %c0_i32 = arith.constant 0 : i32
    %c0_i32_0 = arith.constant 0 : i32
    %c0_i32_1 = arith.constant 0 : i32
    return %arg0, %c0_i32, %c0_i32_0 : i32, i32, i32
  }
}

</mosaic_0001>

<bundles_post_ra>
// kernel: tpu_custom_call.1
= control target key start
LH: loop header
LB: loop body
LE: loop exit
PB: predicated region body
PF: predicated region fallthrough
CT: control target
= control target key end

     0   :  { %s974_s0 = inlined_call_operand.<no memory space> [shape: s32[1], index: 0, kind: input, shape index: {}]   ;;  %s975_s1 = inlined_call_operand.vmem [shape: f32[2,16,32], index: 1, kind: input, shape index: {}]   ;;  %s976_s2 = inlined_call_operand.vmem [shape: bf16[96,32], index: 2, kind: input, shape index: {}]   ;;  %s977_s3 = inlined_call_operand.vmem [shape: f32[1,32], index: 3, kind: input, shape index: {}]   ;;  %s978_s4 = inlined_call_operand.vmem [shape: bf16[32,64], index: 4, kind: input, shape index: {}]   ;;  %s979_s5 = inlined_call_operand.vmem [shape: f32[1,64], index: 5, kind: input, shape index: {}]   ;;  %s980_s6 = inlined_call_operand.hbm [shape: f32[2,16,64], index: 6, kind: output, shape index: {}]  }
   0x1   :  { %11 = sst [smem:[#allocation3]] %s974_s0 }
   0x2   :  { %12 = vsyncpa [#allocation5], 0 }
   0x3   :  { %14 = vsyncpa [#allocation5 + $0x1], 0  ;;  %s831_s23 = smov 0   ;;  %s833_s24 = smov 0  }
   0x4   :  { %s835_s25 = smov 0   ;;  %s837_s26 = smov 0  }
   0x5 LB: > { %s852_s0 = sadd.s32 4294967295, %s784_s26   ;;  %s592_s27 = sadd.s32 4294967294, %s784_s26   ;;  %s784_s26 = sphi %s837_s26, %s986_s26   ;;  %s780_s25 = sphi %s835_s25, %s985_s25   ;;  %s776_s24 = sphi %s833_s24, %s984_s24   ;;  %s772_s23 = sphi %s831_s23, %s983_s23  }
   0x6   : > { %s856_s28 = sadd.s32 1, %s784_s26   ;;  %s137_s29 = sadd.s32 1, %s780_s25 }
   0x7   : > { %s134_s30 = ssub.s32 %s784_s26, %s856_s28  ;;  %p147_p0 = scmp.ne.s32.totalorder %s780_s25, %s776_s24 }
   0x8   : > { %p135_p1 = scmp.eq.s32.totalorder %s134_s30, 0  ;;  %p148_p2 = scmp.eq.s32.totalorder %s852_s0, 1 }
   0x9   : > { %p153_p3 = scmp.ne.s32.totalorder %s776_s24, %s772_s23  ;;  %p154_p4 = scmp.eq.s32.totalorder %s592_s27, 1 }
   0xa   : > { %s867_s7 = scalar_select %p135_p1, %s780_s25, %s137_s29  }
   0xb   : > { %p869_p5 = por %p148_p2, %p147_p0  ;;  %p873_p6 = por %p154_p4, %p153_p3 }
   0xc   : > { %p595_p7 = scmp.ge.s32.totalorder %s784_s26, 1  ;;  %p192_p8 = scmp.lt.s32.totalorder %s784_s26, 3 }
   0xe   : > { %p193_p9 = pnand %p595_p7, %p192_p8 }
   0xf   : > { %p220_p10 = scmp.lt.s32.totalorder (!%p193_p9), %s852_s0, 1  ;;  %v786_v0 = vmov (!%p193_p9), 0.0   ;;  %v698_v1 = vld [vmem:[%s976_s2] sm:$0xff] (!%p193_p9)   ;;  %v699_v2 = vld [vmem:[%s976_s2 + $0x8] sm:$0xff] (!%p193_p9)   ;;  %vm787_vm0 = vmmov (!%p193_p9), 0   ;;  %vm244_vm1 = vcmask (!%p193_p9), 1047552   ;;  %v430_v34 = vlaneseq (!%p193_p9) }
  0x10   : > { %196 = sbr.rel (%p193_p9) target bundleno = 924 (0x39c), region = 40  ;;  %629 = vmatprep.subr.bf16.mxu0 (!%p193_p9), %v786_v0  ;;  %645 = vmatprep.subr.bf16.mxu1 (!%p193_p9), %v786_v0  ;;  %vm245_vm2 = vsmask.f32 (!%p193_p9), 7424  ;;  %v700_v6 = vld [vmem:[%s976_s2 + $0x10] sm:$0xff] (!%p193_p9)   ;;  %s788_s21 = smov (!%p193_p9), 32   ;;  %v701_v11 = vld [vmem:[%s976_s2 + $0x18] sm:$0xff] (!%p193_p9)  }
  0x11   : > { %630 = vmatpush3.bf16.msra.mxu0 (!%p193_p9), %v698_v1  ;;  %641 = vmatprep.mubr.msk.bf16.mxu0 (!%p193_p9), %vm787_vm0, %v786_v0  ;;  %vm246_vm3 = vmand (!%p193_p9), %vm244_vm1, %vm245_vm2  ;;  %s789_s29 = smov (!%p193_p9), 64   ;;  %v702_v15 = vld [vmem:[%s976_s2 + $0x20] sm:$0xff] (!%p193_p9)   ;;  %v703_v16 = vld [vmem:[%s976_s2 + $0x28] sm:$0xff] (!%p193_p9)   ;;  %vm237_vm4 = vcmask (!%p193_p9), 1040384   ;;  %vm238_vm5 = vsmask.f32 (!%p193_p9), 256 }
  0x12   : > { %631 = vmatprep.subr.bf16.mxu0 (!%p193_p9), %v786_v0  ;;  %649 = vmatprep.mubr.msk.bf16.mxu1 (!%p193_p9), %vm787_vm0, %v786_v0  ;;  %vm239_vm6 = vmand (!%p193_p9), %vm237_vm4, %vm238_vm5  ;;  %vm254_vm7 = vcmask (!%p193_p9), 261120   ;;  %vm258_vm8 = vcmask (!%p193_p9), 523264   ;;  %vm316_vm9 = vcmask (!%p193_p9), 785408   ;;  %v704_v22 = vld [vmem:[%s978_s4] sm:$0xff] (!%p193_p9)   ;;  %v705_v23 = vld [vmem:[%s978_s4 + $0x8] sm:$0xff] (!%p193_p9)   ;;  %v431_v35 = vshrl.u32 (!%p193_p9), %v430_v34, 7 }
  0x13   : > { %646 = vmatpush3.bf16.msra.mxu1 (!%p193_p9), %v704_v22  ;;  %v599_v24 = vld [vmem:[%s977_s3] ss:$0 sm:$0xff] (!%p193_p9)  ;;  %s611_s19 = sshll.u32 (!%p193_p9), %s852_s0, 4  ;;  %s443_s20 = sld [smem:[#allocation3]] (!%p193_p9)  ;;  %v434_v40 = vand.u32 (!%p193_p9), 127, %v430_v34 }
  0x14   : > { %647 = vmatprep.subr.bf16.mxu1 (!%p193_p9), %v786_v0  ;;  %v436_v36 = vstv (!%p193_p9), %s611_s19  ;;  %v432_v37 = vadd.s32 (!%p193_p9), 8, %v431_v35  ;;  %s790_s17 = smov (!%p193_p9), [#allocation4]  }
  0x15   : > { %632 = vmatpush3.bf16.msra.mxu0 (!%p193_p9), %v699_v2  ;;  %v437_v38 = vadd.s32 (!%p193_p9), %v436_v36, %v431_v35 }
  0x16   : > { %633 = vmatprep.subr.bf16.mxu0 (!%p193_p9), %v786_v0  ;;  %v438_v39 = vadd.s32 (!%p193_p9), %v436_v36, %v432_v37 }
  0x17   : > { %s221_s10 = scalar_select %p220_p10, %s852_s0, 1  ;;  %648 = vmatpush3.bf16.msra.mxu1 %v705_v23  ;;  %v439_v41 = vmul.u32 64, %v437_v38 }
  0x18   : > { %v440_v42 = vmul.u32 64, %v438_v39 }
  0x19   : > { %s617_s13 = sshll.u32 %s221_s10, 4  ;;  %634 = vmatpush3.bf16.msra.mxu0 %v700_v6  ;;  %v441_v43 = vadd.s32 %v439_v41, %v434_v40  ;;  %s618_s10 = sshll.u32 %s852_s0, 8 }
  0x1a   : > { %s224_s18 = scalar_lea.vmem %s975_s1, %s617_s13  ;;  %635 = vmatprep.subr.bf16.mxu0 %v786_v0  ;;  %v442_v45 = vadd.s32 %v440_v42, %v434_v40  ;;  %s928_s15 = scalar_lea.hbm %s980_s6, %s618_s10 }
  0x1b   : > { %v226_v3 = vld [vmem:[%s224_s18] sm:$0xff]  ;;  %v227_v4 = vld [vmem:[%s224_s18 + $0x8] sm:$0xff]  ;;  %s726_s18 = sshll.u32 %s790_s17, 4  ;;  %s727_s18 = int_to_ptr.vmem [resolvable:$false] %s726_s18 }
  0x1c   : > { %v228_v5 = vpack.c.bf16 %v227_v4, %v226_v3  ;;  %s728_s19 = scalar_lea.vmem %s727_s18, 512 }
  0x1d   : > { %636 = vmatpush3.bf16.msra.mxu0 %v701_v11 }
  0x1e   : > { %249 = vrot.lane.b32.xlu0 %v228_v5, %s788_s21  ;;  %v230_v7 = vshrl.u32 %v228_v5, 16  ;;  %v233_v8 = vshll.u32 %v228_v5, 16  ;;  %637 = vmatprep.subr.bf16.mxu0 %v786_v0  ;;  %s444_s21 = smul.u32 2654435769, %s443_s20 }
  0x20   : > { %v241_v9 = vrot.slane %v233_v8, 1  ;;  %v232_v10 = vrot.slane %v230_v7, 7  ;;  %v445_v44 = vstv %s444_s21 }
  0x21   : > { %638 = vmatpush3.bf16.msra.mxu0 %v702_v15  ;;  %v446_v46 = vadd.s32 %v445_v44, %v441_v43  ;;  %v447_v47 = vadd.s32 %v445_v44, %v442_v45 }
  0x22   : > { %v242_v12 = vor.u32 %v241_v9, %v230_v7  ;;  %v235_v13 = vor.u32 %v233_v8, %v232_v10  ;;  %639 = vmatprep.subr.bf16.mxu0 %v786_v0 }
  0x23   : > { %v448_v48 = vshra.s32 %v446_v46, 16  ;;  %v449_v49 = vshra.s32 %v447_v47, 16 }
  0x24   : > { %v247_v14 = vsel %vm246_vm3, %v242_v12, 0  ;;  %v240_v18 = vsel %vm239_vm6, 0, %v235_v13 }
  0x25   : > { %252 = vrot.lane.b32.xlu0 %v247_v14, %s789_s29  ;;  %640 = vmatpush3.bf16.msra.mxu0 %v703_v16  ;;  %v450_v50 = vxor.u32 %v448_v48, %v446_v46  ;;  %v451_v51 = vxor.u32 %v449_v49, %v447_v47  ;;  %s217_s29 = sand.u32 1, %s776_s24  }
  0x26   : > { %s596_s30 = sshll.u32 %s217_s29, 4  ;;  %s933_s16 = scalar_lea.sflag [#allocation5], %s217_s29 }
  0x27   : > { %v452_v52 = vmul.u32 2246822507, %v450_v50  ;;  %v453_v53 = vmul.u32 2246822507, %v451_v51  ;;  %s219_s11 = scalar_lea.vmem [#allocation4], %s596_s30 }
  0x28   : > { %s530_s12 = sshll.u32 %s219_s11, 4  ;;  %s930_s12 = int_to_ptr.vmem [resolvable:$true] %s530_s12 }
  0x29   : > { %v454_v54 = vshra.s32 %v452_v52, 13  ;;  %v455_v55 = vshra.s32 %v453_v53, 13  ;;  %s722_s0 = scalar_lea.vmem %s930_s12, 256  ;;  %p729_p0 = scmp.lt.s32.totalorder %s930_s12, %s727_s18 }
  0x2a   : > { %p723_p11 = scmp.ne.s32.totalorder %s930_s12, %s722_s0  ;;  %p730_p1 = scmp.lt.s32.totalorder %s728_s19, %s722_s0 }
  0x2b   : > { %v456_v56 = vxor.u32 %v454_v54, %v452_v52  ;;  %v457_v57 = vxor.u32 %v455_v55, %v453_v53 }
  0x2c   : > { %p724_p12 = pnand %p723_p11, %p869_p5  ;;  %p731_p2 = por %p730_p1, %p729_p0 }
  0x2d   : > { %v458_v58 = vmul.u32 3266489909, %v456_v56  ;;  %v459_v59 = vmul.u32 3266489909, %v457_v57 }
  0x2e   : > { %p725_p13 = pneg %p724_p12 }
  0x2f   : > { %v460_v60 = vshra.s32 %v458_v58, 16  ;;  %v461_v61 = vshra.s32 %v459_v59, 16 }
  0x30   : > { %p732_p3 = pnand %p731_p2, %p725_p13 }
  0x31   : > { %v462_v62 = vxor.u32 %v460_v60, %v458_v58  ;;  %v463_v63 = vxor.u32 %v461_v61, %v459_v59 }
  0x33   : > { %v464_v0 = vand.u32 8388607, %v462_v62  ;;  %v465_v1 = vand.u32 8388607, %v463_v63 }
  0x35   : > { %v466_v2 = vcvt.s32.f32 %v464_v0  ;;  %v467_v3 = vcvt.s32.f32 %v465_v1 }
  0x37   : > { %v468_v4 = vmul.f32 1.1920929e-07, %v466_v2  ;;  %v469_v5 = vmul.f32 1.1920929e-07, %v467_v3 }
  0x39   : > { %v470_v6 = vadd.f32 1e-20, %v468_v4  ;;  %v471_v7 = vadd.f32 1e-20, %v469_v5 }
  0x3b   : > { %706 = vlog2.f32 %v470_v6 }
  0x3c   : > { %708 = vlog2.f32 %v471_v7 }
  0x45   : > { %v707_v8 = vpop.eup %706 }
  0x46   : > { %v709_v9 = vpop.eup %708  ;;  %v473_v10 = vmul.f32 0.6931472, %v707_v8 }
  0x47   : > { %v475_v11 = vmul.f32 0.6931472, %v709_v9 }
  0x48   : > { %v476_v12 = vsub.f32 0.0, %v473_v10 }
  0x49   : > { %v477_v13 = vsub.f32 0.0, %v475_v11 }
  0x4a   : > { %v478_v14 = vadd.f32 1e-20, %v476_v12 }
  0x4b   : > { %v479_v15 = vadd.f32 1e-20, %v477_v13 }
  0x4c   : > { %710 = vlog2.f32 %v478_v14 }
  0x4d   : > { %712 = vlog2.f32 %v479_v15 }
  0x56   : > { %v711_v16 = vpop.eup %710 }
  0x90   : > { %v250_v17 = vpop.permute.xlu0 %249 }
  0x91   : > { %v257_v19 = vsel %vm254_vm7, %v240_v18, %v250_v17  ;;  %v713_v17 = vpop.eup %712  ;;  %v481_v18 = vmul.f32 0.6931472, %v711_v16 }
  0x97   : > { %v253_v20 = vpop.permute.xlu0 %252 }
  0x98   : > { %v260_v21 = vsel %vm258_vm8, %v257_v19, %v253_v20  ;;  %v483_v19 = vmul.f32 0.6931472, %v713_v17  ;;  %v607_v20 = vld [vmem:[%s979_s5] ss:$0 sm:$0xff] }
  0x99   : > { %642 = vmatmul.mubr.msk.bf16.vlgmr.msra.gmra.mrb[0].mxu0 %vm316_vm9, %v260_v21  ;;  %v484_v21 = vsub.f32 0.0, %v481_v18 }
 0x16c   : > { %v353_v25 = vpop.f32.mrb[0].mxu0 }
 0x16d   : > { %v354_v26 = vadd.f32 %v599_v24, %v353_v25  ;;  %v643_v27 = vpop.f32.mrb[1].mxu0  ;;  %v485_v25 = vsub.f32 0.0, %v483_v19 }
 0x16e   : > { %v356_v28 = vpop.f32.mrb[2].mxu0 }
 0x16f   : > { %v357_v29 = vadd.f32 %v599_v24, %v356_v28  ;;  %v644_v30 = vpop.f32.mrb[3].mxu0  ;;  %v360_v31 = vmax.f32 %v354_v26, 0.0 }
 0x171   : > { %v361_v32 = vmax.f32 %v357_v29, 0.0 }
 0x173   : > { %v362_v33 = vpack.c.bf16 %v361_v32, %v360_v31 }
 0x175   : > { %650 = vmatmul.mubr.msk.bf16.vlgmr.msra.gmra.mrb[0].mxu1 %vm254_vm7, %v362_v33 }
 0x248   : > { %v423_v22 = vpop.f32.mrb[0].mxu1 }
 0x249   : > { %v424_v23 = vadd.f32 %v607_v20, %v423_v22  ;;  %v651_v24 = vpop.f32.mrb[1].mxu1 }
 0x24a   : > { %v426_v26 = vpop.f32.mrb[2].mxu1 }
 0x24b   : > { %v427_v27 = vadd.f32 %v607_v20, %v426_v26  ;;  %v652_v28 = vpop.f32.mrb[3].mxu1  ;;  %v486_v29 = vadd.f32 %v484_v21, %v424_v23 }
 0x24d   : > { %v487_v30 = vadd.f32 %v485_v25, %v427_v27  ;;  %v488_v31 = vmul.f32 1.1111112, %v486_v29 }
 0x24f   : > { %v490_v32 = vsel %vm258_vm8, %v488_v31, -inf  ;;  %v489_v33 = vmul.f32 1.1111112, %v487_v30 }
 0x250   : > { %491 = vmax.xlane.f32.xlu1 %v490_v32 }
 0x251   : > { %v493_v34 = vsel %vm258_vm8, %v489_v33, -inf }
 0x254   : > { %494 = vmax.xlane.f32.xlu1 %v493_v34 }
 0x2dd   : > { %v492_v35 = vpop.xlane.xlu1 %491 }
 0x2de   : > { %v496_v36 = vsub.f32 %v488_v31, %v492_v35 }
 0x2e0   : > { %v498_v37 = vmul.f32 1.442695, %v496_v36 }
 0x2e1   : > { %v495_v38 = vpop.xlane.xlu1 %494 }
 0x2e2   : > { %714 = vpow2.f32 %v498_v37  ;;  %v497_v39 = vsub.f32 %v489_v33, %v495_v38 }
 0x2e4   : > { %v500_v40 = vmul.f32 1.442695, %v497_v39 }
 0x2e6   : > { %716 = vpow2.f32 %v500_v40 }
 0x2ec   : > { %v715_v41 = vpop.eup %714 }
 0x2ed   : > { %v502_v42 = vsel %vm258_vm8, %v715_v41, 0.0 }
 0x2ee   : > { %503 = vadd.xlane.f32.xlu0 %v502_v42 }
 0x2f0   : > { %v717_v43 = vpop.eup %716 }
 0x2f1   : > { %v505_v44 = vsel %vm258_vm8, %v717_v43, 0.0 }
 0x2f2   : > { %506 = vadd.xlane.f32.xlu1 %v505_v44 }
 0x37b   : > { %v504_v45 = vpop.xlane.xlu0 %503 }
 0x37c   : > { %718 = vrcp.f32 %v504_v45 }
 0x37f   : > { %v507_v46 = vpop.xlane.xlu1 %506 }
 0x380   : > { %720 = vrcp.f32 %v507_v46 }
 0x386   : > { %v719_v47 = vpop.eup %718 }
 0x387   : > { %v512_v48 = vmul.f32 %v719_v47, %v715_v41 }
 0x389   : > { %514 = vst.msk [vmem:[%s219_s11] sm:$0xff] %vm258_vm8, %v512_v48 }
 0x38a   : > { %v721_v49 = vpop.eup %720 }
 0x38b   : > { %v513_v50 = vmul.f32 %v721_v49, %v717_v43 }
 0x38d   : > { %515 = vst.msk [vmem:[%s219_s11 + $0x8] sm:$0xff] %vm258_vm8, %v513_v50 }
 0x38e   : > { %735 = shalt.err (!%p732_p3)
}
 0x38f   : > { %s736_s20 = scalar_lea.hbm %s928_s15, 256  ;;  %s740_s27 = scalar_lea.hbm %s980_s6, 512 }
 0x390   : > { %p737_p4 = scmp.ne.s32.totalorder %s928_s15, %s736_s20  ;;  %p741_p9 = scmp.lt.u32.totalorder %s928_s15, %s980_s6 }
 0x391   : > { %p742_p10 = scmp.lt.u32.totalorder %s740_s27, %s736_s20  ;;  %p744_p12 = scmp.lt.u32.totalorder %s736_s20, %s928_s15 }
 0x392   : > { %p738_p7 = pnand %p737_p4, %p869_p5 }
 0x393   : > { %p743_p11 = por %p742_p10, %p741_p9 }
 0x394   : > { %p739_p8 = pneg %p738_p7 }
 0x395   : > { %p745_p13 = por %p744_p12, %p743_p11 }
 0x397   : > { %p746_p0 = pnand %p745_p13, %p739_p8 }
 0x399   : > { %749 = shalt.err (!%p746_p0)
}
 0x39a   : > { %s791_s10 = smov 128   ;;  %s792_s11 = smov 8  }
 0x39b   : > { %653 = dma.vmem_to_hbm [thread:$0]  (%p869_p5), %s930_s12, 256, %s928_s15, %s933_s16, %s791_s10, %s791_s10, %s792_s11  }
 0x39c PF: > { %p659_p1 = scmp.ge.s32.totalorder %s784_s26, 2  ;;  %s545_s13 = sand.u32 1, %s772_s23  }
 0x39d   : > { %s546_s14 = scalar_lea.sflag [#allocation5], %s545_s13 }
 0x39e   : > { %p656_p2 = pnand %p659_p1, %p873_p6 }
 0x3a0   : > { %767 = dma.done.wait (!%p656_p2), %s546_s14, 256  }
 0x3a1   : > { %769 = vsyncadd (!%p656_p2), %s546_s14, 4294967040  ;;  %p17_p3 = scmp.ge.s32.totalorder %s856_s28, 4   ;;  %s983_s23 = smov %s776_s24 }
 0x3a2   : > { %s984_s24 = smov %s780_s25  ;;  %s985_s25 = smov %s867_s7 }
 0x3a3   : > { %s986_s26 = smov %s856_s28  ;;  %19 = sbr.rel (!%p17_p3) target bundleno = 5 (0x5), region = 75 }
 0x3aa   :  { %551 = vsyncpa [#allocation5], 1 }
 0x3ab   :  { %553 = vsyncpa [#allocation5 + $0x1], 1 }

</bundles_post_ra>
